<compile_context>
chip_gen: v6e
topology: v6e:2x2x1
jax: 0.10.0
libtpu: 0.0.40
codegen_flags: <defaults>
</compile_context>

<pallas_src>
import math
import functools

import jax
import jax.numpy as jnp
from jax.experimental import pallas as pl
from jax.experimental.pallas import tpu as pltpu


def _round_up(x, m):
    return ((x + m - 1) // m) * m


def _support_kernel(x_ref, w_ref, o_ref):
    # support tile = x tile @ weight (MXU, f32 accumulate)
    o_ref[...] = jnp.dot(
        x_ref[...], w_ref[...], preferred_element_type=jnp.float32
    ).astype(o_ref.dtype)


def _aggregate_kernel(adj_ref, s_ref, b_ref, o_ref, acc_ref):
    # out tile = sum_k adj[i, k] @ support[k] + bias   (accumulated in VMEM f32)
    k = pl.program_id(1)

    @pl.when(k == 0)
    def _init():
        acc_ref[...] = jnp.zeros_like(acc_ref)

    acc_ref[...] += jnp.dot(
        adj_ref[...], s_ref[...], preferred_element_type=jnp.float32
    )

    @pl.when(k == pl.num_programs(1) - 1)
    def _finalize():
        # bias added once, on the last reduction step only
        o_ref[...] = (acc_ref[...] + b_ref[...]).astype(o_ref.dtype)


def gcn_forward(x, adj, weight, bias=None, *, compute_dtype=jnp.float32):
    """GCN forward: adj @ (x @ weight) + bias.

    x:      (N, Fin)    node features
    adj:    (N, N)      (dense) adjacency
    weight: (Fin, Fout)
    bias:   (Fout,) or None
    compute_dtype: dtype fed to the MXU (f32 or bf16); accumulation is f32.
    """
    N, Fin = x.shape
    Fout = weight.shape[1]
    f32 = jnp.float32
    c_itemsize = jnp.dtype(compute_dtype).itemsize

    # ---- lane-dense feature padding (avoids masked partial stores) ----
    Fout_pad = _round_up(Fout, 128)

    # ---- tile sizes, aligned to (8, 128) and kept VMEM-friendly ----
    TK = min(512, _round_up(N, 128))   # reduction tile over adj columns
    TM = min(256, _round_up(N, 8))     # output-row tile
    TS = min(256, TK)                  # row tile for the support matmul
    N_k = _round_up(N, TK)             # padded contraction extent
    N_m = _round_up(N, TM)             # padded output-row extent

    # ---- zero-pad operands (zeros keep the math exact) ----
    x_p = jnp.zeros((N_k, Fin), compute_dtype).at[:N, :].set(x.astype(compute_dtype))
    w_p = jnp.zeros((Fin, Fout_pad), compute_dtype).at[:, :Fout].set(
        weight.astype(compute_dtype))
    adj_p = jnp.zeros((N_m, N_k), compute_dtype).at[:N, :N].set(
        adj.astype(compute_dtype))
    if bias is None:
        b_p = jnp.zeros((1, Fout_pad), f32)
    else:
        b_p = jnp.zeros((1, Fout_pad), f32).at[0, :Fout].set(bias.astype(f32))

    # ---- kernel 1: support = x @ weight (tiled over rows) ----
    support = pl.pallas_call(
        _support_kernel,
        out_shape=jax.ShapeDtypeStruct((N_k, Fout_pad), compute_dtype),
        grid_spec=pltpu.PrefetchScalarGridSpec(
            num_scalar_prefetch=0,
            grid=(N_k // TS,),
            in_specs=[
                pl.BlockSpec((TS, Fin), lambda i: (i, 0)),
                pl.BlockSpec((Fin, Fout_pad), lambda i: (0, 0)),
            ],
            out_specs=pl.BlockSpec((TS, Fout_pad), lambda i: (i, 0)),
        ),
        compiler_params=pltpu.CompilerParams(
            dimension_semantics=("parallel",)),
        cost_estimate=pl.CostEstimate(
            flops=2 * N_k * Fin * Fout_pad,
            transcendentals=0,
            bytes_accessed=(N_k * Fin * c_itemsize
                            + Fin * Fout_pad * c_itemsize
                            + N_k * Fout_pad * c_itemsize)),
    )(x_p, w_p)

    # ---- kernel 2: out = adj @ support + bias (tiled, accumulated) ----
    out_p = pl.pallas_call(
        _aggregate_kernel,
        out_shape=jax.ShapeDtypeStruct((N_m, Fout_pad), f32),
        grid_spec=pltpu.PrefetchScalarGridSpec(
            num_scalar_prefetch=0,
            grid=(N_m // TM, N_k // TK),
            in_specs=[
                pl.BlockSpec((TM, TK), lambda i, k: (i, k)),
                pl.BlockSpec((TK, Fout_pad), lambda i, k: (k, 0)),
                pl.BlockSpec((1, Fout_pad), lambda i, k: (0, 0)),
            ],
            out_specs=pl.BlockSpec((TM, Fout_pad), lambda i, k: (i, 0)),
            scratch_shapes=[pltpu.VMEM((TM, Fout_pad), f32)],
        ),
        compiler_params=pltpu.CompilerParams(
            dimension_semantics=("parallel", "arbitrary")),
        cost_estimate=pl.CostEstimate(
            flops=2 * N_m * N_k * Fout_pad,
            transcendentals=0,
            bytes_accessed=(N_m * N_k * c_itemsize
                            + N_k * Fout_pad * c_itemsize
                            + N_m * Fout_pad * 4
                            + Fout_pad * 4)),
    )(adj_p, support, b_p)

    # slice padding away
    return out_p[:N, :Fout]


if __name__ == "__main__":
    # Small shapes consistent with the module: N nodes, in_features, out_features
    N, in_features, out_features = 8, 16, 32

    key = jax.random.PRNGKey(0)
    k_x, k_adj, k_w, k_b = jax.random.split(key, 4)

    # Deterministic parameter init mirroring reset_parameters():
    #   stdv = 1 / sqrt(out_features); uniform(-stdv, stdv)
    stdv = 1.0 / math.sqrt(out_features)
    weight = jax.random.uniform(k_w, (in_features, out_features),
                                minval=-stdv, maxval=stdv, dtype=jnp.float32)
    bias = jax.random.uniform(k_b, (out_features,),
                              minval=-stdv, maxval=stdv, dtype=jnp.float32)

    # Example inputs: node features + a row-normalized dense adjacency.
    # TODO(synk): torch.spmm sparse adjacency path is implemented as a dense matmul.
    x = jax.random.normal(k_x, (N, in_features), dtype=jnp.float32)
    a_raw = jax.random.uniform(k_adj, (N, N), dtype=jnp.float32)
    adj = (a_raw + a_raw.T) * 0.5 + jnp.eye(N, dtype=jnp.float32)
    adj = adj / jnp.sum(adj, axis=1, keepdims=True)  # row-normalized

    ref = adj @ (x @ weight) + bias

    # f32 path (tight tolerance)
    gcn_f32 = jax.jit(functools.partial(gcn_forward, compute_dtype=jnp.float32))
    out_f32 = jax.block_until_ready(gcn_f32(x, adj, weight, bias))
    assert out_f32.shape == (N, out_features)
    assert jnp.allclose(out_f32, ref, atol=1e-5, rtol=1e-5), "f32 mismatch vs reference"

    # bf16-operand path (MXU-friendly on v6e/v7x), f32 accumulation — looser tol
    gcn_bf16 = jax.jit(functools.partial(gcn_forward, compute_dtype=jnp.bfloat16))
    out_bf16 = jax.block_until_ready(gcn_bf16(x, adj, weight, bias))
    assert out_bf16.shape == (N, out_features)
    assert jnp.allclose(out_bf16, ref, atol=3e-2, rtol=3e-2), "bf16 mismatch vs reference"

    print("KERNEL_OK")
</pallas_src>

<mosaic_0001>
module attributes {stable_mosaic.version = 11 : i64} {
  func.func @_support_kernel(%arg0: i32, %arg1: memref<128x16xf32, #tpu.memory_space<vmem>>, %arg2: memref<16x128xf32, #tpu.memory_space<vmem>>, %arg3: memref<128x128xf32, #tpu.memory_space<vmem>>) attributes {dimension_semantics = [#tpu.dimension_semantics<parallel>], iteration_bounds = array<i64: 1>, scalar_prefetch = 0 : i64, scratch_operands = 0 : i64, tpu.core_type = #tpu.core_type<tc>, window_params = [{transform_indices = @transform_0, window_bounds = array<i64: 128, 16>}, {pipeline_mode = #tpu.pipeline_mode<synchronous>, transform_indices = @transform_1, window_bounds = array<i64: 16, 128>}, {transform_indices = @transform_2, window_bounds = array<i64: 128, 128>}]} {
    %c0 = arith.constant 0 : index
    %c0_0 = arith.constant 0 : index
    %0 = vector.load %arg1[%c0, %c0_0] : memref<128x16xf32, #tpu.memory_space<vmem>>, vector<128x16xf32>
    %c0_1 = arith.constant 0 : index
    %c0_2 = arith.constant 0 : index
    %1 = vector.load %arg2[%c0_1, %c0_2] : memref<16x128xf32, #tpu.memory_space<vmem>>, vector<16x128xf32>
    %cst = arith.constant dense<0.000000e+00> : vector<128x128xf32>
    %2 = tpu.matmul %0, %1, %cst {dimension_numbers = #tpu.dot_dimension_numbers<[1], [0], [0], [1], [0, 0, 1, 1], [], []>} : vector<128x16xf32>, vector<16x128xf32>, vector<128x128xf32> -> vector<128x128xf32>
    %c0_3 = arith.constant 0 : index
    %c0_4 = arith.constant 0 : index
    %3 = vector.load %arg3[%c0_3, %c0_4] : memref<128x128xf32, #tpu.memory_space<vmem>>, vector<128x128xf32>
    tpu.vector_store %arg3[%c0_3, %c0_4], %2 {strides = array<i32>} : memref<128x128xf32, #tpu.memory_space<vmem>>, vector<128x128xf32>,
    return
  }
  func.func @transform_0(%arg0: i32) -> (i32, i32) {
    %c0_i32 = arith.constant 0 : i32
    %c0_i32_0 = arith.constant 0 : i32
    return %arg0, %c0_i32 : i32, i32
  }
  func.func @transform_1(%arg0: i32) -> (i32, i32) {
    %c0_i32 = arith.constant 0 : i32
    %c0_i32_0 = arith.constant 0 : i32
    %c0_i32_1 = arith.constant 0 : i32
    return %c0_i32, %c0_i32_0 : i32, i32
  }
  func.func @transform_2(%arg0: i32) -> (i32, i32) {
    %c0_i32 = arith.constant 0 : i32
    %c0_i32_0 = arith.constant 0 : i32
    return %arg0, %c0_i32 : i32, i32
  }
}

module attributes {stable_mosaic.version = 11 : i64} {
  func.func @_aggregate_kernel(%arg0: i32, %arg1: i32, %arg2: memref<8x128xf32, #tpu.memory_space<vmem>>, %arg3: memref<128x128xf32, #tpu.memory_space<vmem>>, %arg4: memref<1x128xf32, #tpu.memory_space<vmem>>, %arg5: memref<8x128xf32, #tpu.memory_space<vmem>>, %arg6: memref<8x128xf32, #tpu.memory_space<vmem>>) attributes {dimension_semantics = [#tpu.dimension_semantics<parallel>, #tpu.dimension_semantics<arbitrary>], iteration_bounds = array<i64: 1, 1>, scalar_prefetch = 0 : i64, scratch_operands = 1 : i64, tpu.core_type = #tpu.core_type<tc>, window_params = [{transform_indices = @transform_0, window_bounds = array<i64: 8, 128>}, {transform_indices = @transform_1, window_bounds = array<i64: 128, 128>}, {pipeline_mode = #tpu.pipeline_mode<synchronous>, transform_indices = @transform_2, window_bounds = array<i64: 1, 128>}, {transform_indices = @transform_3, window_bounds = array<i64: 8, 128>}]} {
    %c0_i32 = arith.constant 0 : i32
    %0 = arith.cmpi eq, %arg1, %c0_i32 : i32
    %1 = arith.extui %0 : i1 to i32
    %c0_i32_0 = arith.constant 0 : i32
    %2 = arith.cmpi ne, %1, %c0_i32_0 : i32
    scf.if %2 {
      %cst_10 = arith.constant 0.000000e+00 : f32
      %12 = vector.broadcast %cst_10 : f32 to vector<8x128xf32>
      %c0_11 = arith.constant 0 : index
      %c0_12 = arith.constant 0 : index
      %13 = vector.load %arg6[%c0_11, %c0_12] : memref<8x128xf32, #tpu.memory_space<vmem>>, vector<8x128xf32>
      tpu.vector_store %arg6[%c0_11, %c0_12], %12 {strides = array<i32>} : memref<8x128xf32, #tpu.memory_space<vmem>>, vector<8x128xf32>,
    } else {
    }
    %c0 = arith.constant 0 : index
    %c0_1 = arith.constant 0 : index
    %3 = vector.load %arg6[%c0, %c0_1] : memref<8x128xf32, #tpu.memory_space<vmem>>, vector<8x128xf32>
    %c0_2 = arith.constant 0 : index
    %c0_3 = arith.constant 0 : index
    %4 = vector.load %arg2[%c0_2, %c0_3] : memref<8x128xf32, #tpu.memory_space<vmem>>, vector<8x128xf32>
    %c0_4 = arith.constant 0 : index
    %c0_5 = arith.constant 0 : index
    %5 = vector.load %arg3[%c0_4, %c0_5] : memref<128x128xf32, #tpu.memory_space<vmem>>, vector<128x128xf32>
    %cst = arith.constant dense<0.000000e+00> : vector<8x128xf32>
    %6 = tpu.matmul %4, %5, %cst {dimension_numbers = #tpu.dot_dimension_numbers<[1], [0], [0], [1], [0, 0, 1, 1], [], []>} : vector<8x128xf32>, vector<128x128xf32>, vector<8x128xf32> -> vector<8x128xf32>
    %7 = arith.addf %3, %6 : vector<8x128xf32>
    %c0_6 = arith.constant 0 : index
    %c0_7 = arith.constant 0 : index
    %8 = vector.load %arg6[%c0_6, %c0_7] : memref<8x128xf32, #tpu.memory_space<vmem>>, vector<8x128xf32>
    tpu.vector_store %arg6[%c0_6, %c0_7], %7 {strides = array<i32>} : memref<8x128xf32, #tpu.memory_space<vmem>>, vector<8x128xf32>,
    %c0_i32_8 = arith.constant 0 : i32
    %9 = arith.cmpi eq, %arg1, %c0_i32_8 : i32
    %10 = arith.extui %9 : i1 to i32
    %c0_i32_9 = arith.constant 0 : i32
    %11 = arith.cmpi ne, %10, %c0_i32_9 : i32
    scf.if %11 {
      %c0_10 = arith.constant 0 : index
      %c0_11 = arith.constant 0 : index
      %12 = vector.load %arg6[%c0_10, %c0_11] : memref<8x128xf32, #tpu.memory_space<vmem>>, vector<8x128xf32>
      %c0_12 = arith.constant 0 : index
      %c0_13 = arith.constant 0 : index
      %13 = vector.load %arg4[%c0_12, %c0_13] : memref<1x128xf32, #tpu.memory_space<vmem>>, vector<1x128xf32>
      %14 = vector.broadcast %13 : vector<1x128xf32> to vector<8x128xf32>
      %15 = arith.addf %12, %14 : vector<8x128xf32>
      %c0_14 = arith.constant 0 : index
      %c0_15 = arith.constant 0 : index
      %16 = vector.load %arg5[%c0_14, %c0_15] : memref<8x128xf32, #tpu.memory_space<vmem>>, vector<8x128xf32>
      tpu.vector_store %arg5[%c0_14, %c0_15], %15 {strides = array<i32>} : memref<8x128xf32, #tpu.memory_space<vmem>>, vector<8x128xf32>,
    } else {
    }
    return
  }
  func.func @transform_0(%arg0: i32, %arg1: i32) -> (i32, i32) {
    %c0_i32 = arith.constant 0 : i32
    return %arg0, %arg1 : i32, i32
  }
  func.func @transform_1(%arg0: i32, %arg1: i32) -> (i32, i32) {
    %c0_i32 = arith.constant 0 : i32
    %c0_i32_0 = arith.constant 0 : i32
    return %arg1, %c0_i32 : i32, i32
  }
  func.func @transform_2(%arg0: i32, %arg1: i32) -> (i32, i32) {
    %c0_i32 = arith.constant 0 : i32
    %c0_i32_0 = arith.constant 0 : i32
    %c0_i32_1 = arith.constant 0 : i32
    return %c0_i32, %c0_i32_0 : i32, i32
  }
  func.func @transform_3(%arg0: i32, %arg1: i32) -> (i32, i32) {
    %c0_i32 = arith.constant 0 : i32
    %c0_i32_0 = arith.constant 0 : i32
    return %arg0, %c0_i32 : i32, i32
  }
}

</mosaic_0001>

<bundles_post_ra>
// kernel: gcn_forward.3
= control target key start
LH: loop header
LB: loop body
LE: loop exit
PB: predicated region body
PF: predicated region fallthrough
CT: control target
= control target key end

     0   :  { %v215_v1 = vmov 0.0   ;;  %vm216_vm0 = vmmov 0   ;;  %s295_s0 = inlined_call_operand.vmem [shape: f32[8,128], index: 0, kind: input, shape index: {}]   ;;  %s296_s1 = inlined_call_operand.vmem [shape: f32[128,128], index: 1, kind: input, shape index: {}]   ;;  %s297_s2 = inlined_call_operand.vmem [shape: f32[1,128], index: 2, kind: input, shape index: {}]   ;;  %s298_s3 = inlined_call_operand.hbm [shape: f32[8,128], index: 3, kind: output, shape index: {}]  }
   0x1   :  { %v37_v0 = vld [vmem:[%s296_s1 + $0x78] sm:$0xff]  ;;  %155 = vmatprep.subr.mxu0 %v215_v1  ;;  %v36_v2 = vld [vmem:[%s296_s1 + $0x70] sm:$0xff]  ;;  %187 = vmatprep.mubr.msk.f32.mxu0 %vm216_vm0, %v215_v1  ;;  %v35_v3 = vld [vmem:[%s296_s1 + $0x68] sm:$0xff] }
   0x2   :  { %156 = vmatpush3.msra.mxu0 %v37_v0  ;;  %v34_v4 = vld [vmem:[%s296_s1 + $0x60] sm:$0xff] }
   0x3   :  { %157 = vmatprep.subr.mxu0 %v215_v1 }
   0x4   :  { %158 = vmatpush3.msra.mxu0 %v36_v2 }
   0x5   :  { %159 = vmatprep.subr.mxu0 %v215_v1 }
   0x6   :  { %8 = vsyncpa [#allocation4], 0  ;;  %160 = vmatpush3.msra.mxu0 %v35_v3  ;;  %v33_v5 = vld [vmem:[%s296_s1 + $0x58] sm:$0xff]  ;;  %v32_v6 = vld [vmem:[%s296_s1 + $0x50] sm:$0xff]  ;;  %s217_s21 = smov [#allocation3]  }
   0x7   :  { %161 = vmatprep.subr.mxu0 %v215_v1  ;;  %v31_v7 = vld [vmem:[%s296_s1 + $0x48] sm:$0xff]  ;;  %v30_v8 = vld [vmem:[%s296_s1 + $0x40] sm:$0xff]  ;;  %v29_v9 = vld [vmem:[%s296_s1 + $0x38] sm:$0xff]  ;;  %s129_s22 = sshll.u32 %s217_s21, 4  ;;  %s130_s22 = int_to_ptr.vmem [resolvable:$true] %s129_s22 }
   0x8   :  { %162 = vmatpush3.msra.mxu0 %v34_v4  ;;  %v28_v10 = vld [vmem:[%s296_s1 + $0x30] sm:$0xff]  ;;  %v27_v11 = vld [vmem:[%s296_s1 + $0x28] sm:$0xff]  ;;  %v26_v12 = vld [vmem:[%s296_s1 + $0x20] sm:$0xff]  ;;  %p198_p1 = scmp.lt.s32.totalorder %s130_s22, %s130_s22 }
   0x9   :  { %163 = vmatprep.subr.mxu0 %v215_v1  ;;  %v25_v13 = vld [vmem:[%s296_s1 + $0x18] sm:$0xff]  ;;  %v24_v14 = vld [vmem:[%s296_s1 + $0x10] sm:$0xff]  ;;  %v23_v15 = vld [vmem:[%s296_s1 + $0x8] sm:$0xff] }
   0xa   :  { %164 = vmatpush3.msra.mxu0 %v33_v5  ;;  %v22_v16 = vld [vmem:[%s296_s1] sm:$0xff]  ;;  %s193_s1 = scalar_lea.vmem %s130_s22, 128 }
   0xb   :  { %165 = vmatprep.subr.mxu0 %v215_v1  ;;  %v21_v17 = vld [vmem:[%s295_s0] sm:$0xff]  ;;  %p194_p0 = scmp.ne.s32.totalorder %s130_s22, %s193_s1  ;;  %p199_p2 = scmp.lt.s32.totalorder %s193_s1, %s193_s1 }
   0xc   :  { %166 = vmatpush3.msra.mxu0 %v32_v6  ;;  %v137_v18 = vld [vmem:[%s297_s2] ss:$0 sm:$0xff] }
   0xd   :  { %167 = vmatprep.subr.mxu0 %v215_v1  ;;  %p200_p3 = por %p199_p2, %p198_p1 }
   0xe   :  { %168 = vmatpush3.msra.mxu0 %v31_v7 }
   0xf   :  { %169 = vmatprep.subr.mxu0 %v215_v1  ;;  %p201_p4 = pnand %p200_p3, %p194_p0 }
  0x10   :  { %170 = vmatpush3.msra.mxu0 %v30_v8 }
  0x11   :  { %171 = vmatprep.subr.mxu0 %v215_v1 }
  0x12   :  { %172 = vmatpush3.msra.mxu0 %v29_v9 }
  0x13   :  { %173 = vmatprep.subr.mxu0 %v215_v1 }
  0x14   :  { %174 = vmatpush3.msra.mxu0 %v28_v10 }
  0x15   :  { %175 = vmatprep.subr.mxu0 %v215_v1 }
  0x16   :  { %176 = vmatpush3.msra.mxu0 %v27_v11 }
  0x17   :  { %177 = vmatprep.subr.mxu0 %v215_v1 }
  0x18   :  { %178 = vmatpush3.msra.mxu0 %v26_v12 }
  0x19   :  { %179 = vmatprep.subr.mxu0 %v215_v1 }
  0x1a   :  { %180 = vmatpush3.msra.mxu0 %v25_v13 }
  0x1b   :  { %181 = vmatprep.subr.mxu0 %v215_v1 }
  0x1c   :  { %182 = vmatpush3.msra.mxu0 %v24_v14 }
  0x1d   :  { %183 = vmatprep.subr.mxu0 %v215_v1 }
  0x1e   :  { %184 = vmatpush3.msra.mxu0 %v23_v15 }
  0x1f   :  { %185 = vmatprep.subr.mxu0 %v215_v1 }
  0x20   :  { %186 = vmatpush3.msra.mxu0 %v22_v16 }
  0x21   :  { %188 = vmatmul.mubr.f32.vlgmr.msra.gmra.mxu0 %v21_v17 }
  0xe1   :  { %v104_v19 = vpop.f32.mrf.mxu0 }
  0xe2   :  { %v121_v20 = vadd.f32 %v137_v18, %v104_v19 }
  0xe3   :  { %v189_v21 = vpop.f32.mrf.mxu0 }
  0xe4   :  { %122 = vst [vmem:[#allocation3] sm:$0xff] %v121_v20 }
  0xe5   :  { %204 = shalt.err (!%p201_p4)
}
  0xe6   :  { %132 = dma.vmem_to_hbm [thread:$0]  %s130_s22, 128, %s298_s3, [#allocation4]  }
  0xe7   :  { %213 = dma.done.wait [#allocation4], 128  }
  0xe8   :  { %214 = vsyncadd [#allocation4], 4294967168 }
  0xe9   :  { %136 = vsyncpa [#allocation4], 1 }

// kernel: gcn_forward.2
= control target key start
LH: loop header
LB: loop body
LE: loop exit
PB: predicated region body
PF: predicated region fallthrough
CT: control target
= control target key end

     0   :  { %vm29_vm0 = vcmask 130048   ;;  %s442_s1 = inlined_call_operand.vmem [shape: f32[16,128], index: 1, kind: input, shape index: {}]   ;;  %s443_s0 = inlined_call_operand.vmem [shape: f32[128,16], index: 0, kind: input, shape index: {}]   ;;  %s444_s2 = inlined_call_operand.vmem [shape: f32[128,128], index: 2, kind: output, shape index: {}]  }
   0x1   :  { %v28_v0 = vld [vmem:[%s442_s1 + $0x8] sm:$0xff]  ;;  %v27_v1 = vld [vmem:[%s442_s1] sm:$0xff]  ;;  %v13_v6 = vld [vmem:[%s443_s0 + $0x10] sm:$0xff] }
   0x2   :  { %277 = vmatprep.subr.mxu0 %v28_v0  ;;  %305 = vmatprep.subr.mxu1 %v28_v0  ;;  %v11_v2 = vld [vmem:[%s443_s0] sm:$0xff]  ;;  %v12_v4 = vld [vmem:[%s443_s0 + $0x8] sm:$0xff]  ;;  %v21_v7 = vld [vmem:[%s443_s0 + $0x50] sm:$0xff] }
   0x3   :  { %278 = vmatpush3.msra.mxu0 %v28_v0  ;;  %307 = vmatpush3.msra.mxu1 %v28_v0  ;;  %v19_v3 = vld [vmem:[%s443_s0 + $0x40] sm:$0xff]  ;;  %v20_v5 = vld [vmem:[%s443_s0 + $0x48] sm:$0xff]  ;;  %v14_v8 = vld [vmem:[%s443_s0 + $0x18] sm:$0xff] }
   0x4   :  { %279 = vmatprep.subr.mxu0 %v27_v1  ;;  %306 = vmatprep.subr.mxu1 %v27_v1  ;;  %v22_v9 = vld [vmem:[%s443_s0 + $0x58] sm:$0xff]  ;;  %v15_v10 = vld [vmem:[%s443_s0 + $0x20] sm:$0xff]  ;;  %v16_v12 = vld [vmem:[%s443_s0 + $0x28] sm:$0xff] }
   0x5   :  { %280 = vmatpush3.msra.mxu0 %v27_v1  ;;  %308 = vmatpush3.msra.mxu1 %v27_v1  ;;  %v23_v11 = vld [vmem:[%s443_s0 + $0x60] sm:$0xff]  ;;  %v24_v13 = vld [vmem:[%s443_s0 + $0x68] sm:$0xff]  ;;  %v17_v14 = vld [vmem:[%s443_s0 + $0x30] sm:$0xff] }
   0x6   :  { %281 = vmatprep.mubr.msk.f32.mxu0 %vm29_vm0, %v11_v2  ;;  %293 = vmatprep.mubr.msk.f32.mxu1 %vm29_vm0, %v19_v3  ;;  %v25_v15 = vld [vmem:[%s443_s0 + $0x70] sm:$0xff]  ;;  %v18_v16 = vld [vmem:[%s443_s0 + $0x38] sm:$0xff] }
   0x7   :  { %282 = vmatmul.mubr.msk.f32.vlgmr.msra.gmra.mxu0 %vm29_vm0, %v12_v4  ;;  %294 = vmatmul.mubr.msk.f32.vlgmr.msra.gmra.mxu1 %vm29_vm0, %v20_v5  ;;  %v26_v17 = vld [vmem:[%s443_s0 + $0x78] sm:$0xff] }
   0x8   :  { %284 = vmatprep.mubr.msk.f32.mxu0 %vm29_vm0, %v13_v6  ;;  %296 = vmatprep.mubr.msk.f32.mxu1 %vm29_vm0, %v21_v7 }
   0xb   :  { %285 = vmatmul.mubr.msk.f32.gmra.mxu0 %vm29_vm0, %v14_v8  ;;  %297 = vmatmul.mubr.msk.f32.gmra.mxu1 %vm29_vm0, %v22_v9 }
   0xc   :  { %287 = vmatprep.mubr.msk.f32.mxu0 %vm29_vm0, %v15_v10  ;;  %299 = vmatprep.mubr.msk.f32.mxu1 %vm29_vm0, %v23_v11 }
   0xf   :  { %288 = vmatmul.mubr.msk.f32.gmra.mxu0 %vm29_vm0, %v16_v12  ;;  %300 = vmatmul.mubr.msk.f32.gmra.mxu1 %vm29_vm0, %v24_v13 }
  0x10   :  { %290 = vmatprep.mubr.msk.f32.mxu0 %vm29_vm0, %v17_v14  ;;  %302 = vmatprep.mubr.msk.f32.mxu1 %vm29_vm0, %v25_v15 }
  0x13   :  { %291 = vmatmul.mubr.msk.f32.gmra.mxu0 %vm29_vm0, %v18_v16  ;;  %303 = vmatmul.mubr.msk.f32.gmra.mxu1 %vm29_vm0, %v26_v17 }
  0xc7   :  { %v283_v18 = vpop.f32.mrf.mxu0  ;;  %v295_v19 = vpop.f32.mrf.mxu1 }
  0xc8   :  { %224 = vst [vmem:[%s444_s2 + $0x8] sm:$0xff] %v283_v18  ;;  %232 = vst [vmem:[%s444_s2 + $0x48] sm:$0xff] %v295_v19 }
  0xc9   :  { %v144_v20 = vpop.f32.mrf.mxu0  ;;  %v184_v21 = vpop.f32.mrf.mxu1 }
  0xca   :  { %223 = vst [vmem:[%s444_s2] sm:$0xff] %v144_v20  ;;  %231 = vst [vmem:[%s444_s2 + $0x40] sm:$0xff] %v184_v21 }
  0xcb   :  { %v286_v22 = vpop.f32.mrf.mxu0  ;;  %v298_v23 = vpop.f32.mrf.mxu1 }
  0xcc   :  { %226 = vst [vmem:[%s444_s2 + $0x18] sm:$0xff] %v286_v22  ;;  %234 = vst [vmem:[%s444_s2 + $0x58] sm:$0xff] %v298_v23 }
  0xcd   :  { %v154_v24 = vpop.f32.mrf.mxu0  ;;  %v194_v25 = vpop.f32.mrf.mxu1 }
  0xce   :  { %225 = vst [vmem:[%s444_s2 + $0x10] sm:$0xff] %v154_v24  ;;  %233 = vst [vmem:[%s444_s2 + $0x50] sm:$0xff] %v194_v25 }
  0xcf   :  { %v289_v26 = vpop.f32.mrf.mxu0  ;;  %v301_v27 = vpop.f32.mrf.mxu1 }
  0xd0   :  { %228 = vst [vmem:[%s444_s2 + $0x28] sm:$0xff] %v289_v26  ;;  %236 = vst [vmem:[%s444_s2 + $0x68] sm:$0xff] %v301_v27 }
  0xd1   :  { %v164_v28 = vpop.f32.mrf.mxu0  ;;  %v204_v29 = vpop.f32.mrf.mxu1 }
  0xd2   :  { %227 = vst [vmem:[%s444_s2 + $0x20] sm:$0xff] %v164_v28  ;;  %235 = vst [vmem:[%s444_s2 + $0x60] sm:$0xff] %v204_v29 }
  0xd3   :  { %v292_v30 = vpop.f32.mrf.mxu0  ;;  %v304_v31 = vpop.f32.mrf.mxu1 }
  0xd4   :  { %230 = vst [vmem:[%s444_s2 + $0x38] sm:$0xff] %v292_v30  ;;  %238 = vst [vmem:[%s444_s2 + $0x78] sm:$0xff] %v304_v31 }
  0xd5   :  { %v174_v32 = vpop.f32.mrf.mxu0  ;;  %v214_v33 = vpop.f32.mrf.mxu1 }
  0xd6   :  { %229 = vst [vmem:[%s444_s2 + $0x30] sm:$0xff] %v174_v32  ;;  %237 = vst [vmem:[%s444_s2 + $0x70] sm:$0xff] %v214_v33 }

</bundles_post_ra>
